<compile_context>
chip_gen: v7x
topology: tpu7x:2x2x1
jax: 0.10.0
libtpu: 0.0.40
codegen_flags: <defaults>
</compile_context>

<pallas_src>
import functools
import math

import jax
import jax.numpy as jnp
from jax import lax
from jax.experimental import pallas as pl
from jax.experimental.pallas import tpu as pltpu


# ----------------------------------------------------------------------------
# helpers
# ----------------------------------------------------------------------------
def _round_up(x, m):
    return (x + m - 1) // m * m


def _cdiv(a, b):
    return (a + b - 1) // b


def _vmem_config():
    """Return (vmem_limit_bytes, block working-set budget in bytes)."""
    try:
        cap = int(pltpu.get_tpu_info().vmem_capacity_bytes)
    except Exception:
        cap = 64 * 1024 * 1024  # conservative fallback = v7x physical VMEM
    limit = min(cap * 3 // 4, 96 * 1024 * 1024)
    # leave ~half the scoped limit for Mosaic temporaries / other buffers
    return limit, limit // 2


def _pick_tiles_cf(n_rows, n_cols, in_bytes, out_bytes, budget):
    """Tiles for the (B*C, H*W) channels-on-rows layout."""
    per_elem = 2 * (in_bytes + out_bytes)  # double-buffered input + output block
    tl = min(_round_up(n_cols, 128),
             max(128, (budget // (8 * per_elem)) // 128 * 128))
    tr = min(_round_up(n_rows, 8),
             max(8, (budget // (tl * per_elem)) // 8 * 8))
    # ensure >= 2 row blocks when possible so megacore can shard the row axis
    if n_rows > 8:
        tr = min(tr, _round_up(_cdiv(n_rows, 2), 8))
    return tr, tl


def _pick_tm_cl(n_rows, n_cols, in_bytes, out_bytes, budget):
    """Row tile for the (M, C) channel-last layout."""
    per_row = _round_up(n_cols, 128) * 2 * (in_bytes + out_bytes)
    tm = min(_round_up(n_rows, 8), max(8, (budget // per_row) // 8 * 8))
    # ensure >= 2 row blocks when possible so megacore can shard / split
    if n_rows > 8:
        tm = min(tm, _round_up(_cdiv(n_rows, 2), 8))
    return tm


# ----------------------------------------------------------------------------
# channel_first=True kernels: x2d is (B*C, H*W), params is (B*C, 2)=[mean,scale]
# ----------------------------------------------------------------------------
def _norm_cf_kernel(x_ref, p_ref, y_ref):
    x = x_ref[...].astype(jnp.float32)
    mu = p_ref[:, 0:1]
    scale = p_ref[:, 1:2]
    y_ref[...] = ((x - mu) * scale).astype(y_ref.dtype)


def _fused_cf_kernel(x_ref, p_ref, y_ref, mean_ref, m2_ref, *, n_cols, tl):
    # grid = (row_blocks [parallel], lane_blocks [arbitrary, innermost])
    j = pl.program_id(1)

    @pl.when(j == 0)
    def _():
        mean_ref[...] = jnp.zeros_like(mean_ref)
        m2_ref[...] = jnp.zeros_like(m2_ref)

    x = x_ref[...].astype(jnp.float32)          # (tr, tl)
    mu = p_ref[:, 0:1]                          # running mean   (tr, 1)
    scale = p_ref[:, 1:2]                       # rsqrt(var+eps) (tr, 1)
    y_ref[...] = ((x - mu) * scale).astype(y_ref.dtype)

    # masked per-row block statistics over the lane (spatial) axis
    lane = lax.broadcasted_iota(jnp.int32, x.shape, 1)
    valid = (j * tl + lane) < n_cols
    nb = jnp.minimum(tl, n_cols - j * tl).astype(jnp.float32)   # block count >= 1
    xm = jnp.where(valid, x, 0.0)
    m_b = jnp.sum(xm, axis=1, keepdims=True) / nb               # block mean
    d = jnp.where(valid, x - m_b, 0.0)
    m2_b = jnp.sum(d * d, axis=1, keepdims=True)                # block centered SS

    # Chan merge into the resident (tr, 1) output accumulators
    n = (j * tl).astype(jnp.float32)            # elements accumulated so far
    n_new = n + nb
    delta = m_b - mean_ref[...]
    mean_ref[...] = mean_ref[...] + delta * (nb / n_new)
    m2_ref[...] = m2_ref[...] + m2_b + delta * delta * (n * nb / n_new)


def _normalize_cf(x2d, params):
    R, L = x2d.shape
    vmem_limit, budget = _vmem_config()
    tr, tl = _pick_tiles_cf(R, L, x2d.dtype.itemsize, x2d.dtype.itemsize, budget)
    grid = (_cdiv(R, tr), _cdiv(L, tl))
    return pl.pallas_call(
        _norm_cf_kernel,
        out_shape=jax.ShapeDtypeStruct((R, L), x2d.dtype),
        grid_spec=pltpu.PrefetchScalarGridSpec(
            num_scalar_prefetch=0,
            grid=grid,
            in_specs=[pl.BlockSpec((tr, tl), lambda i, j: (i, j)),
                      pl.BlockSpec((tr, 2), lambda i, j: (i, 0))],
            out_specs=pl.BlockSpec((tr, tl), lambda i, j: (i, j)),
        ),
        compiler_params=pltpu.CompilerParams(
            dimension_semantics=("parallel", "parallel"),
            vmem_limit_bytes=vmem_limit),
    )(x2d, params)


def _fused_cf(x2d, params, B, C, L):
    R, Lx = x2d.shape
    vmem_limit, budget = _vmem_config()
    tr, tl = _pick_tiles_cf(R, Lx, x2d.dtype.itemsize, x2d.dtype.itemsize, budget)
    grid = (_cdiv(R, tr), _cdiv(Lx, tl))
    y2d, row_mean, row_m2 = pl.pallas_call(
        functools.partial(_fused_cf_kernel, n_cols=Lx, tl=tl),
        out_shape=(jax.ShapeDtypeStruct((R, Lx), x2d.dtype),
                   jax.ShapeDtypeStruct((R, 1), jnp.float32),   # per-row mean
                   jax.ShapeDtypeStruct((R, 1), jnp.float32)),  # per-row centered SS
        grid_spec=pltpu.PrefetchScalarGridSpec(
            num_scalar_prefetch=0,
            grid=grid,
            in_specs=[pl.BlockSpec((tr, tl), lambda i, j: (i, j)),
                      pl.BlockSpec((tr, 2), lambda i, j: (i, 0))],
            out_specs=[pl.BlockSpec((tr, tl), lambda i, j: (i, j)),
                       pl.BlockSpec((tr, 1), lambda i, j: (i, 0)),
                       pl.BlockSpec((tr, 1), lambda i, j: (i, 0))],
        ),
        compiler_params=pltpu.CompilerParams(
            # row axis parallel -> megacore shards it; lane axis carries the
            # stats accumulator -> arbitrary, innermost.
            dimension_semantics=("parallel", "arbitrary"),
            vmem_limit_bytes=vmem_limit),
    )(x2d, params)

    # combine per-(batch, channel) partials (Chan / ANOVA decomposition)
    rm = row_mean.reshape(B, C)
    rm2 = row_m2.reshape(B, C)
    batch_mean = rm.mean(axis=0)
    batch_m2 = rm2.sum(axis=0) + L * jnp.sum((rm - batch_mean) ** 2, axis=0)
    batch_var = batch_m2 / (B * L)
    return y2d, batch_mean, batch_var


# ----------------------------------------------------------------------------
# channel_first=False kernels: x2d is (M, C), params is (2, C)=[mean; scale]
# ----------------------------------------------------------------------------
def _norm_cl_kernel(x_ref, p_ref, y_ref):
    x = x_ref[...].astype(jnp.float32)
    mu = p_ref[0:1, :]
    scale = p_ref[1:2, :]
    y_ref[...] = ((x - mu) * scale).astype(y_ref.dtype)


def _fused_cl_kernel(x_ref, p_ref, y_ref, mean_ref, m2_ref, cnt_ref, *,
                     n_rows, tm, inner_blocks):
    # grid = (row_groups [parallel], row_blocks_per_group [arbitrary])
    s = pl.program_id(0)
    i = pl.program_id(1)

    @pl.when(i == 0)
    def _():
        mean_ref[...] = jnp.zeros_like(mean_ref)
        m2_ref[...] = jnp.zeros_like(m2_ref)
        cnt_ref[...] = jnp.zeros_like(cnt_ref)

    x = x_ref[...].astype(jnp.float32)          # (tm, C)
    mu = p_ref[0:1, :]
    scale = p_ref[1:2, :]
    y_ref[...] = ((x - mu) * scale).astype(y_ref.dtype)

    # per-block column statistics, masked to the valid rows of this block
    # (row_start uses the UNclamped global block index, so fully-OOB duplicate
    #  blocks at a ragged group tail contribute exactly zero).
    row_start = (s * inner_blocks + i) * tm
    nb_i = jnp.clip(n_rows - row_start, 0, tm)                  # valid rows
    row = lax.broadcasted_iota(jnp.int32, x.shape, 0)
    valid = row < nb_i
    nb = nb_i.astype(jnp.float32)
    xm = jnp.where(valid, x, 0.0)
    m_b = jnp.sum(xm, axis=0, keepdims=True) / jnp.maximum(nb, 1.0)   # (1, C)
    d = jnp.where(valid, x - m_b, 0.0)
    m2_b = jnp.sum(d * d, axis=0, keepdims=True)                      # (1, C)

    # Chan merge into this group's resident (8, C) accumulators
    n = cnt_ref[...]
    n_new = n + nb
    f = nb / jnp.maximum(n_new, 1.0)
    delta = m_b - mean_ref[...]
    mean_ref[...] = mean_ref[...] + delta * f
    m2_ref[...] = m2_ref[...] + m2_b + delta * delta * (n * f)
    cnt_ref[...] = n_new


def _normalize_cl(x2d, params):
    M, C = x2d.shape
    vmem_limit, budget = _vmem_config()
    tm = _pick_tm_cl(M, C, x2d.dtype.itemsize, x2d.dtype.itemsize, budget)
    return pl.pallas_call(
        _norm_cl_kernel,
        out_shape=jax.ShapeDtypeStruct((M, C), x2d.dtype),
        grid_spec=pltpu.PrefetchScalarGridSpec(
            num_scalar_prefetch=0,
            grid=(_cdiv(M, tm),),
            in_specs=[pl.BlockSpec((tm, C), lambda i: (i, 0)),
                      pl.BlockSpec((2, C), lambda i: (0, 0))],
            out_specs=pl.BlockSpec((tm, C), lambda i: (i, 0)),
        ),
        compiler_params=pltpu.CompilerParams(
            dimension_semantics=("parallel",),
            vmem_limit_bytes=vmem_limit),
    )(x2d, params)


def _fused_cl(x2d, params, n_splits_hint=2):
    M, C = x2d.shape
    vmem_limit, budget = _vmem_config()
    tm = _pick_tm_cl(M, C, x2d.dtype.itemsize, x2d.dtype.itemsize, budget)
    n_blocks = _cdiv(M, tm)
    n_splits = max(1, min(n_splits_hint, n_blocks))   # <=2 groups, >=1 block each
    inner = _cdiv(n_blocks, n_splits)
    last_blk = n_blocks - 1
    if n_splits * inner == n_blocks:
        xy_map = lambda s, i: (s * inner + i, 0)
    else:
        # ragged group tail: clamp to the last valid block (idempotent rewrite;
        # its stats contribution is masked to zero inside the kernel).
        xy_map = lambda s, i: (jnp.minimum(s * inner + i, last_blk), 0)

    y2d, mean_p, m2_p, cnt_p = pl.pallas_call(
        functools.partial(_fused_cl_kernel, n_rows=M, tm=tm, inner_blocks=inner),
        out_shape=(jax.ShapeDtypeStruct((M, C), x2d.dtype),
                   jax.ShapeDtypeStruct((n_splits * 8, C), jnp.float32),  # mean
                   jax.ShapeDtypeStruct((n_splits * 8, C), jnp.float32),  # m2
                   jax.ShapeDtypeStruct((n_splits * 8, C), jnp.float32)), # count
        grid_spec=pltpu.PrefetchScalarGridSpec(
            num_scalar_prefetch=0,
            grid=(n_splits, inner),
            in_specs=[pl.BlockSpec((tm, C), xy_map),
                      pl.BlockSpec((2, C), lambda s, i: (0, 0))],
            out_specs=[pl.BlockSpec((tm, C), xy_map),
                       pl.BlockSpec((8, C), lambda s, i: (s, 0)),
                       pl.BlockSpec((8, C), lambda s, i: (s, 0)),
                       pl.BlockSpec((8, C), lambda s, i: (s, 0))],
        ),
        compiler_params=pltpu.CompilerParams(
            # group axis parallel -> v7x megacore runs both halves concurrently;
            # inner row-block axis carries the accumulators -> arbitrary.
            dimension_semantics=("parallel", "arbitrary"),
            vmem_limit_bytes=vmem_limit),
    )(x2d, params)

    # combine per-group partial statistics (Chan / pooled-variance formula)
    pm = mean_p.reshape(n_splits, 8, C)[:, 0, :]
    pm2 = m2_p.reshape(n_splits, 8, C)[:, 0, :]
    pc = cnt_p.reshape(n_splits, 8, C)[:, 0, :]
    total = jnp.sum(pc, axis=0)                          # == M for every column
    batch_mean = jnp.sum(pc * pm, axis=0) / total
    batch_m2 = jnp.sum(pm2 + pc * (pm - batch_mean) ** 2, axis=0)
    batch_var = batch_m2 / total
    return y2d, batch_mean, batch_var


# ----------------------------------------------------------------------------
# Functional DataNorm forward (single device)
# ----------------------------------------------------------------------------
def datanorm_forward(x, mean, var, num_batches_tracked, *, eps=1e-6,
                     channel_first=True, gather_mode="global",
                     training=False, frozen=False):
    assert gather_mode in ("global", "none")
    if training and x.shape[0] == 1:
        raise NotImplementedError(
            "DataNorm batch_size=1 requires syncing features instead of stats")
    # TODO(synk): gather_mode='global' with torch.distributed initialized does an
    # async all_gather of features across ranks; single-device path only here.

    need_stats = training and not frozen
    mean_f = mean.astype(jnp.float32)
    scale_f = lax.rsqrt(var.astype(jnp.float32) + eps)

    if channel_first:
        B, C = x.shape[0], x.shape[1]
        L = math.prod(x.shape[2:])
        R = B * C
        x2d = x.reshape(R, L)                                    # free view
        params = jnp.stack([jnp.tile(mean_f, B), jnp.tile(scale_f, B)], axis=1)
        if need_stats:
            y2d, batch_mean, batch_var = _fused_cf(x2d, params, B, C, L)
        else:
            y2d = _normalize_cf(x2d, params)
        y = y2d.reshape(x.shape)
    else:
        C = x.shape[-1]
        M = math.prod(x.shape[:-1])
        x2d = x.reshape(M, C)                                    # free view
        params = jnp.stack([mean_f, scale_f], axis=0)            # (2, C)
        if need_stats:
            y2d, batch_mean, batch_var = _fused_cl(x2d, params)
        else:
            y2d = _normalize_cl(x2d, params)
        y = y2d.reshape(x.shape)

    if need_stats:
        new_num = num_batches_tracked + 1.0
        momentum = 1.0 / new_num
        new_mean = mean * (1.0 - momentum) + batch_mean.astype(mean.dtype) * momentum
        new_var = var * (1.0 - momentum) + batch_var.astype(var.dtype) * momentum
        return y, (new_mean, new_var, new_num)
    return y, (mean, var, num_batches_tracked)


# ----------------------------------------------------------------------------
if __name__ == "__main__":
    key = jax.random.PRNGKey(0)

    # ---- channel_first=True (NCHW), the module default -----------------------
    B, C, H, W = 2, 4, 16, 16
    x = jax.random.normal(key, (B, C, H, W), dtype=jnp.float32) * 2.0 + 0.5
    mean = jnp.zeros((C,), jnp.float32)
    var = jnp.ones((C,), jnp.float32)
    nbt = jnp.array(0.0, jnp.float32)

    y_train, (mean1, var1, nbt1) = datanorm_forward(
        x, mean, var, nbt, training=True)
    y_eval, _ = datanorm_forward(x, mean1, var1, nbt1, training=False)
    jax.block_until_ready((y_train, y_eval, mean1, var1, nbt1))

    # pure-JAX reference
    x2d = jnp.moveaxis(x, 1, -1).reshape(-1, C)
    ref_train = jnp.moveaxis(
        ((x2d - mean) / jnp.sqrt(var + 1e-6)).reshape(B, H, W, C), -1, 1)
    ref_mean = x2d.mean(axis=0)
    ref_var = ((x2d - ref_mean) ** 2).mean(axis=0)
    ref_eval = jnp.moveaxis(
        ((x2d - ref_mean) / jnp.sqrt(ref_var + 1e-6)).reshape(B, H, W, C), -1, 1)
    assert jnp.allclose(y_train, ref_train, atol=1e-5, rtol=1e-5)
    assert jnp.allclose(mean1, ref_mean, atol=1e-5, rtol=1e-5)
    assert jnp.allclose(var1, ref_var, atol=1e-5, rtol=1e-5)
    assert jnp.allclose(y_eval, ref_eval, atol=1e-4, rtol=1e-4)
    assert float(nbt1) == 1.0

    # ---- channel_first=False ((B, S, D) feature layout) ----------------------
    B2, S, D = 2, 8, 32
    x_cl = jax.random.normal(jax.random.PRNGKey(1), (B2, S, D), jnp.float32) + 1.0
    mean_cl = jnp.zeros((D,), jnp.float32)
    var_cl = jnp.ones((D,), jnp.float32)
    nbt_cl = jnp.array(0.0, jnp.float32)

    y_cl, (m_cl, v_cl, n_cl) = datanorm_forward(
        x_cl, mean_cl, var_cl, nbt_cl, channel_first=False, training=True)
    jax.block_until_ready((y_cl, m_cl, v_cl, n_cl))

    x_cl2 = x_cl.reshape(-1, D)
    ref_y_cl = ((x_cl2 - mean_cl) / jnp.sqrt(var_cl + 1e-6)).reshape(x_cl.shape)
    ref_m_cl = x_cl2.mean(axis=0)
    ref_v_cl = ((x_cl2 - ref_m_cl) ** 2).mean(axis=0)
    assert jnp.allclose(y_cl, ref_y_cl, atol=1e-5, rtol=1e-5)
    assert jnp.allclose(m_cl, ref_m_cl, atol=1e-5, rtol=1e-5)
    assert jnp.allclose(v_cl, ref_v_cl, atol=1e-5, rtol=1e-5)

    # eval for channel_last too
    y_cl_eval, _ = datanorm_forward(
        x_cl, m_cl, v_cl, n_cl, channel_first=False, training=False)
    jax.block_until_ready(y_cl_eval)
    ref_y_cl_eval = ((x_cl2 - ref_m_cl) / jnp.sqrt(ref_v_cl + 1e-6)).reshape(x_cl.shape)
    assert jnp.allclose(y_cl_eval, ref_y_cl_eval, atol=1e-4, rtol=1e-4)

    print("KERNEL_OK")
</pallas_src>

<mosaic_0001>
module attributes {stable_mosaic.version = 11 : i64} {
  func.func @_fused_cf_kernel(%arg0: i32, %arg1: i32, %arg2: memref<8x256xf32, #tpu.memory_space<vmem>>, %arg3: memref<8x2xf32, #tpu.memory_space<vmem>>, %arg4: memref<8x256xf32, #tpu.memory_space<vmem>>, %arg5: memref<8x1xf32, #tpu.memory_space<vmem>>, %arg6: memref<8x1xf32, #tpu.memory_space<vmem>>) attributes {dimension_semantics = [#tpu.dimension_semantics<parallel>, #tpu.dimension_semantics<arbitrary>], iteration_bounds = array<i64: 1, 1>, scalar_prefetch = 0 : i64, scratch_operands = 0 : i64, tpu.core_type = #tpu.core_type<tc>, window_params = [{transform_indices = @transform_0, window_bounds = array<i64: 8, 256>}, {transform_indices = @transform_1, window_bounds = array<i64: 8, 2>}, {transform_indices = @transform_2, window_bounds = array<i64: 8, 256>}, {transform_indices = @transform_3, window_bounds = array<i64: 8, 1>}, {transform_indices = @transform_4, window_bounds = array<i64: 8, 1>}]} {
    %c0_i32 = arith.constant 0 : i32
    %0 = arith.cmpi eq, %arg1, %c0_i32 : i32
    %1 = arith.extui %0 : i1 to i32
    %c0_i32_0 = arith.constant 0 : i32
    %2 = arith.cmpi ne, %1, %c0_i32_0 : i32
    scf.if %2 {
      %cst_25 = arith.constant 0.000000e+00 : f32
      %54 = vector.broadcast %cst_25 : f32 to vector<8x1xf32>
      %c0_26 = arith.constant 0 : index
      %c0_27 = arith.constant 0 : index
      %55 = vector.load %arg5[%c0_26, %c0_27] : memref<8x1xf32, #tpu.memory_space<vmem>>, vector<8x1xf32>
      tpu.vector_store %arg5[%c0_26, %c0_27], %54 {strides = array<i32>} : memref<8x1xf32, #tpu.memory_space<vmem>>, vector<8x1xf32>,
      %cst_28 = arith.constant 0.000000e+00 : f32
      %56 = vector.broadcast %cst_28 : f32 to vector<8x1xf32>
      %c0_29 = arith.constant 0 : index
      %c0_30 = arith.constant 0 : index
      %57 = vector.load %arg6[%c0_29, %c0_30] : memref<8x1xf32, #tpu.memory_space<vmem>>, vector<8x1xf32>
      tpu.vector_store %arg6[%c0_29, %c0_30], %56 {strides = array<i32>} : memref<8x1xf32, #tpu.memory_space<vmem>>, vector<8x1xf32>,
    } else {
    }
    %c0 = arith.constant 0 : index
    %c0_1 = arith.constant 0 : index
    %3 = vector.load %arg2[%c0, %c0_1] : memref<8x256xf32, #tpu.memory_space<vmem>>, vector<8x256xf32>
    %c0_2 = arith.constant 0 : index
    %c0_3 = arith.constant 0 : index
    %4 = vector.load %arg3[%c0_2, %c0_3] : memref<8x2xf32, #tpu.memory_space<vmem>>, vector<8x1xf32>
    %c0_4 = arith.constant 0 : index
    %c1 = arith.constant 1 : index
    %5 = vector.load %arg3[%c0_4, %c1] : memref<8x2xf32, #tpu.memory_space<vmem>>, vector<8x1xf32>
    %6 = vector.broadcast %4 : vector<8x1xf32> to vector<8x256xf32>
    %7 = arith.subf %3, %6 : vector<8x256xf32>
    %8 = vector.broadcast %5 : vector<8x1xf32> to vector<8x256xf32>
    %9 = arith.mulf %7, %8 : vector<8x256xf32>
    %c0_5 = arith.constant 0 : index
    %c0_6 = arith.constant 0 : index
    %10 = vector.load %arg4[%c0_5, %c0_6] : memref<8x256xf32, #tpu.memory_space<vmem>>, vector<8x256xf32>
    tpu.vector_store %arg4[%c0_5, %c0_6], %9 {strides = array<i32>} : memref<8x256xf32, #tpu.memory_space<vmem>>, vector<8x256xf32>,
    %11 = tpu.iota {dimensions = array<i32: 1>} : vector<8x256xi32>
    %c256_i32 = arith.constant 256 : i32
    %12 = arith.muli %arg1, %c256_i32 : i32
    %13 = vector.broadcast %12 : i32 to vector<8x256xi32>
    %14 = arith.addi %13, %11 : vector<8x256xi32>
    %c256_i32_7 = arith.constant 256 : i32
    %15 = vector.broadcast %c256_i32_7 : i32 to vector<8x256xi32>
    %16 = arith.cmpi slt, %14, %15 : vector<8x256xi32>
    %c256_i32_8 = arith.constant 256 : i32
    %17 = arith.muli %arg1, %c256_i32_8 : i32
    %c256_i32_9 = arith.constant 256 : i32
    %18 = arith.subi %c256_i32_9, %17 : i32
    %c256_i32_10 = arith.constant 256 : i32
    %19 = arith.minsi %c256_i32_10, %18 : i32
    %20 = arith.sitofp %19 : i32 to f32
    %cst = arith.constant 0.000000e+00 : f32
    %21 = vector.broadcast %cst : f32 to vector<8x256xf32>
    %22 = arith.select %16, %3, %21 : vector<8x256xi1>, vector<8x256xf32>
    %cst_11 = arith.constant dense<0.000000e+00> : vector<8xf32>
    %23 = vector.multi_reduction <add>, %22, %cst_11 [1] : vector<8x256xf32> to vector<8xf32>
    %24 = vector.shape_cast %23 : vector<8xf32> to vector<8x1xf32>
    %25 = vector.broadcast %20 : f32 to vector<8x1xf32>
    %26 = arith.divf %24, %25 : vector<8x1xf32>
    %27 = vector.broadcast %26 : vector<8x1xf32> to vector<8x256xf32>
    %28 = arith.subf %3, %27 : vector<8x256xf32>
    %cst_12 = arith.constant 0.000000e+00 : f32
    %29 = vector.broadcast %cst_12 : f32 to vector<8x256xf32>
    %30 = arith.select %16, %28, %29 : vector<8x256xi1>, vector<8x256xf32>
    %31 = arith.mulf %30, %30 : vector<8x256xf32>
    %cst_13 = arith.constant dense<0.000000e+00> : vector<8xf32>
    %32 = vector.multi_reduction <add>, %31, %cst_13 [1] : vector<8x256xf32> to vector<8xf32>
    %33 = vector.shape_cast %32 : vector<8xf32> to vector<8x1xf32>
    %c256_i32_14 = arith.constant 256 : i32
    %34 = arith.muli %arg1, %c256_i32_14 : i32
    %35 = arith.sitofp %34 : i32 to f32
    %36 = arith.addf %35, %20 : f32
    %c0_15 = arith.constant 0 : index
    %c0_16 = arith.constant 0 : index
    %37 = vector.load %arg5[%c0_15, %c0_16] : memref<8x1xf32, #tpu.memory_space<vmem>>, vector<8x1xf32>
    %38 = arith.subf %26, %37 : vector<8x1xf32>
    %c0_17 = arith.constant 0 : index
    %c0_18 = arith.constant 0 : index
    %39 = vector.load %arg5[%c0_17, %c0_18] : memref<8x1xf32, #tpu.memory_space<vmem>>, vector<8x1xf32>
    %40 = arith.divf %20, %36 : f32
    %41 = vector.broadcast %40 : f32 to vector<8x1xf32>
    %42 = arith.mulf %38, %41 : vector<8x1xf32>
    %43 = arith.addf %39, %42 : vector<8x1xf32>
    %c0_19 = arith.constant 0 : index
    %c0_20 = arith.constant 0 : index
    %44 = vector.load %arg5[%c0_19, %c0_20] : memref<8x1xf32, #tpu.memory_space<vmem>>, vector<8x1xf32>
    tpu.vector_store %arg5[%c0_19, %c0_20], %43 {strides = array<i32>} : memref<8x1xf32, #tpu.memory_space<vmem>>, vector<8x1xf32>,
    %c0_21 = arith.constant 0 : index
    %c0_22 = arith.constant 0 : index
    %45 = vector.load %arg6[%c0_21, %c0_22] : memref<8x1xf32, #tpu.memory_space<vmem>>, vector<8x1xf32>
    %46 = arith.addf %45, %33 : vector<8x1xf32>
    %47 = arith.mulf %38, %38 : vector<8x1xf32>
    %48 = arith.mulf %35, %20 : f32
    %49 = arith.divf %48, %36 : f32
    %50 = vector.broadcast %49 : f32 to vector<8x1xf32>
    %51 = arith.mulf %47, %50 : vector<8x1xf32>
    %52 = arith.addf %46, %51 : vector<8x1xf32>
    %c0_23 = arith.constant 0 : index
    %c0_24 = arith.constant 0 : index
    %53 = vector.load %arg6[%c0_23, %c0_24] : memref<8x1xf32, #tpu.memory_space<vmem>>, vector<8x1xf32>
    tpu.vector_store %arg6[%c0_23, %c0_24], %52 {strides = array<i32>} : memref<8x1xf32, #tpu.memory_space<vmem>>, vector<8x1xf32>,
    return
  }
  func.func @transform_0(%arg0: i32, %arg1: i32) -> (i32, i32) {
    %c0_i32 = arith.constant 0 : i32
    return %arg0, %arg1 : i32, i32
  }
  func.func @transform_1(%arg0: i32, %arg1: i32) -> (i32, i32) {
    %c0_i32 = arith.constant 0 : i32
    %c0_i32_0 = arith.constant 0 : i32
    return %arg0, %c0_i32 : i32, i32
  }
  func.func @transform_2(%arg0: i32, %arg1: i32) -> (i32, i32) {
    %c0_i32 = arith.constant 0 : i32
    return %arg0, %arg1 : i32, i32
  }
  func.func @transform_3(%arg0: i32, %arg1: i32) -> (i32, i32) {
    %c0_i32 = arith.constant 0 : i32
    %c0_i32_0 = arith.constant 0 : i32
    return %arg0, %c0_i32 : i32, i32
  }
  func.func @transform_4(%arg0: i32, %arg1: i32) -> (i32, i32) {
    %c0_i32 = arith.constant 0 : i32
    %c0_i32_0 = arith.constant 0 : i32
    return %arg0, %c0_i32 : i32, i32
  }
}

</mosaic_0001>

<bundles_post_ra>
// kernel: tpu_custom_call.1
= control target key start
LH: loop header
LB: loop body
LE: loop exit
PB: predicated region body
PF: predicated region fallthrough
CT: control target
= control target key end

     0   :  { %10 = vsyncpa [#allocation3], 0  ;;  %s265_s0 = inlined_call_operand.hbm [shape: f32[8,256], index: 0, kind: input, shape index: {}]   ;;  %s266_s1 = inlined_call_operand.vmem [shape: f32[8,2], index: 1, kind: input, shape index: {}]   ;;  %s267_s2 = inlined_call_operand.hbm [shape: f32[8,256], index: 2, kind: output, shape index: {0}]   ;;  %s268_s3 = inlined_call_operand.vmem [shape: f32[8,1], index: 3, kind: output, shape index: {1}]   ;;  %s269_s4 = inlined_call_operand.vmem [shape: f32[8,1], index: 4, kind: output, shape index: {2}]  }
   0x1   :  { %11 = vsyncpa [#allocation4], 0  ;;  %s186_s15 = smov [#allocation2]   ;;  %s138_s19 = scalar_lea.hbm %s265_s0, 256 }
   0x2   :  { %s18_s16 = sshll.u32 %s186_s15, 4  ;;  %p139_p0 = scmp.ne.s32.totalorder %s265_s0, %s138_s19  ;;  %s19_s16 = int_to_ptr.vmem [resolvable:$true] %s18_s16 }
   0x3   :  { %p142_p1 = scmp.lt.u32.totalorder %s138_s19, %s265_s0 }
   0x5   :  { %p144_p2 = pnand %p142_p1, %p139_p0 }
   0x7   :  { %147 = shalt.err (!%p144_p2)
}
   0x8   :  { %s148_s24 = scalar_lea.vmem %s19_s16, 256  ;;  %p153_p4 = scmp.lt.s32.totalorder %s19_s16, %s19_s16 }
   0x9   :  { %p149_p3 = scmp.ne.s32.totalorder %s19_s16, %s148_s24  ;;  %p154_p5 = scmp.lt.s32.totalorder %s148_s24, %s148_s24 }
   0xb   :  { %p155_p6 = por %p154_p5, %p153_p4 }
   0xd   :  { %p156_p7 = pnand %p155_p6, %p149_p3 }
   0xf   :  { %159 = shalt.err (!%p156_p7)
}
  0x10   :  { %21 = dma.hbm_to_vmem [thread:$0]  %s265_s0, 256, %s19_s16, [#allocation3]  }
  0x11   :  { %182 = dma.done.wait [#allocation3], 256  }
  0x12   :  { %183 = vsyncadd [#allocation3], 4294967040  ;;  %vm31_vm0 = vcmask 7168   ;;  %v187_v0 = vmov 0.0   ;;  %v34_v1 = vld [vmem:[#allocation2] sm:$0xff]  ;;  %v35_v2 = vld [vmem:[#allocation2 + $0x8] sm:$0xff] }
  0x13   :  { %32 = vst.msk [vmem:[%s268_s3] sm:$0xff] %vm31_vm0, %v187_v0  ;;  %33 = vst.msk [vmem:[%s269_s4] sm:$0xff] %vm31_vm0, %v187_v0  ;;  %v67_v3 = vadd.f32 %v35_v2, %v34_v1  ;;  %v36_v4 = vld [vmem:[%s266_s1] sm:$0xff]  ;;  %v188_v5 = vmov 0   ;;  %v189_v6 = vmov 1   ;;  %s190_s9 = smov [#allocation5]  }
  0x14   :  { %135 = vset.pattern.permute.xlu1 %v188_v5  ;;  %137 = vset.pattern.permute.xlu0 %v189_v6  ;;  %s113_s10 = sshll.u32 %s190_s9, 4  ;;  %s114_s10 = int_to_ptr.vmem [resolvable:$true] %s113_s10 }
  0x15   :  { %68 = vadd.xlane.f32.xlu0 %v67_v3  ;;  %39 = vperm.xlu1 %135, %v36_v4   ;;  %s160_s11 = scalar_lea.vmem %s114_s10, 256  ;;  %p165_p9 = scmp.lt.s32.totalorder %s114_s10, %s114_s10 }
  0x16   :  { %p161_p8 = scmp.ne.s32.totalorder %s114_s10, %s160_s11  ;;  %p166_p10 = scmp.lt.s32.totalorder %s160_s11, %s160_s11 }
  0x18   :  { %p167_p11 = por %p166_p10, %p165_p9 }
  0x19   :  { %136 = vset.pattern.permute.xlu1 %v189_v6 }
  0x1a   :  { %45 = vperm.xlu1 %136, %v36_v4   ;;  %v84_v8 = vld [vmem:[%s268_s3] sm:$0xff]  ;;  %p168_p12 = pnand %p167_p11, %p161_p8 }
  0x94   :  { %v40_v17 = vpop.permute.xlu1 %39 }
  0x95   :  { %v42_v18 = vsub.f32 %v34_v1, %v40_v17  ;;  %v43_v19 = vsub.f32 %v35_v2, %v40_v17 }
  0x99   :  { %v46_v20 = vpop.permute.xlu1 %45 }
  0x9a   :  { %v48_v21 = vmul.f32 %v46_v20, %v42_v18  ;;  %v49_v22 = vmul.f32 %v46_v20, %v43_v19 }
  0x9c   :  { %50 = vst [vmem:[#allocation5] sm:$0xff] %v48_v21  ;;  %51 = vst [vmem:[#allocation5 + $0x8] sm:$0xff] %v49_v22 }
  0xa2   :  { %v69_v7 = vpop.xlane.xlu0 %68 }
  0xa3   :  { %v72_v9 = vmul.f32 0.00390625, %v69_v7 }
  0xa5   :  { %v85_v10 = vsub.f32 %v72_v9, %v84_v8  ;;  %v73_v11 = vsub.f32 %v34_v1, %v72_v9  ;;  %v74_v12 = vsub.f32 %v35_v2, %v72_v9 }
  0xa7   :  { %v92_v13 = vadd.f32 %v85_v10, %v84_v8  ;;  %v77_v14 = vmul.f32 %v73_v11, %v73_v11  ;;  %v78_v15 = vmul.f32 %v74_v12, %v74_v12 }
  0xa9   :  { %94 = vst.msk [vmem:[%s268_s3] sm:$0xff] %vm31_vm0, %v92_v13  ;;  %v79_v16 = vadd.f32 %v78_v15, %v77_v14 }
  0xab   :  { %80 = vadd.xlane.f32.xlu0 %v79_v16 }
  0xac   :  { %171 = shalt.err (!%p168_p12)
}
  0xad   :  { %s172_s13 = scalar_lea.hbm %s267_s2, 256 }
  0xae   :  { %p173_p13 = scmp.ne.s32.totalorder %s267_s2, %s172_s13  ;;  %p176_p0 = scmp.lt.u32.totalorder %s172_s13, %s267_s2 }
  0xb0   :  { %p178_p1 = pnand %p176_p0, %p173_p13 }
  0xb2   :  { %181 = shalt.err (!%p178_p1)
}
  0xb3   :  { %116 = dma.vmem_to_hbm [thread:$0]  %s114_s10, 256, %s267_s2, [#allocation4]   ;;  %v97_v23 = vmul.f32 %v85_v10, %v85_v10  ;;  %v95_v24 = vld [vmem:[%s269_s4] sm:$0xff] }
  0xb5   :  { %v104_v27 = vmul.f32 0.0, %v97_v23 }
 0x138   :  { %v81_v25 = vpop.xlane.xlu0 %80 }
 0x139   :  { %v96_v26 = vadd.f32 %v95_v24, %v81_v25 }
 0x13b   :  { %v105_v28 = vadd.f32 %v104_v27, %v96_v26 }
 0x13d   :  { %106 = vst.msk [vmem:[%s269_s4] sm:$0xff] %vm31_vm0, %v105_v28 }
 0x13e   :  { %184 = dma.done.wait [#allocation4], 256  }
 0x13f   :  { %185 = vsyncadd [#allocation4], 4294967040 }
 0x140   :  { %128 = vsyncpa [#allocation3], 1 }
 0x141   :  { %129 = vsyncpa [#allocation4], 1 }

</bundles_post_ra>
